<compile_context>
chip_gen: v5e
topology: v5e:2x2
jax: 0.10.0
libtpu: 0.0.40
codegen_flags: <defaults>
</compile_context>

<pallas_src>
import math
from functools import partial

import numpy as np

import jax
import jax.numpy as jnp
from jax import lax
from jax.experimental import pallas as pl
from jax.experimental.pallas import tpu as pltpu


# ----------------------------- generation-aware VMEM budget -----------------------------

def _detect_vmem_capacity():
    try:
        return int(pltpu.get_tpu_info().vmem_capacity_bytes)
    except Exception:
        return 64 << 20  # conservative fallback (v7x per-core VMEM; also hit on CPU interpret)


_VMEM_CAP = _detect_vmem_capacity()
if _VMEM_CAP >= (96 << 20):          # v5e / v6e: 128 MiB physical VMEM
    _VMEM_BLOCK_BUDGET = 56 << 20
    _VMEM_LIMIT_BYTES = 100 << 20
else:                                # v7x (64 MiB per TensorCore) / unknown
    _VMEM_BLOCK_BUDGET = 24 << 20
    _VMEM_LIMIT_BYTES = 48 << 20

_PARAMS = pltpu.CompilerParams(
    dimension_semantics=("parallel",),   # tiles are independent -> both TCs on v7x
    vmem_limit_bytes=_VMEM_LIMIT_BYTES,
)


def _round_up(v, m):
    return ((v + m - 1) // m) * m


def _padded_bytes(sub, lane, itemsize):
    """VMEM footprint of a (sub, lane) tile after (8, 128) layout padding."""
    return _round_up(sub, 8) * _round_up(lane, 128) * itemsize


def _pick_tile(n, live_bytes_per_item, reserve=0):
    """Largest tile along the grid axis whose live VMEM (double buffering already folded
    into live_bytes_per_item) fits the budget; capped at ceil(n/2) so the grid has >= 2
    steps whenever n >= 2 (pipeline overlap / v7x megacore sharding)."""
    # TODO(synk): add a second grid axis over rows if even tile=1 exceeds the budget
    # (only relevant for extremely large single images).
    budget = max(_VMEM_BLOCK_BUDGET - reserve, live_bytes_per_item)
    t = max(1, min(n, budget // max(1, live_bytes_per_item)))
    if n >= 2:
        t = min(t, (n + 1) // 2)
    return int(t)


def _smem_spec():
    return pl.BlockSpec(memory_space=pltpu.MemorySpace.SMEM)


# ----------------------------- kernels -----------------------------

def _hflip_kernel(x_ref, j_ref, o_ref):
    # K.RandomHorizontalFlip(p=1): reverse W via a (W,W) anti-diagonal permutation matmul.
    # Result is requested directly in x.dtype (the permutation is exact in bf16 too).
    # The (n,H,W)->(n*H,W) reshape is a free view when H % 8 == 0 (typical image sizes).
    n, h, w = x_ref.shape
    flipped = jnp.dot(x_ref[...].reshape(n * h, w), j_ref[...],
                      preferred_element_type=o_ref.dtype)
    o_ref[...] = flipped.reshape(n, h, w)


def _wm_dropout_kernel(p_ref, x_ref, x0_ref, u_ref, o_ref, *, C, H):
    # RandomWatermarkDropout(dropout_p=(0.05,0.2)): replace a random fraction p of pixels
    # (same mask across channels) with the original image x0.
    # TODO(synk): pltpu.prng_random_bits has no interpret/CPU lowering, so the uniforms
    # arrive as a (bt,H,W) f32 operand generated with jax.random outside the kernel.
    drop = u_ref[...] < p_ref[0]                      # (bt, H, W) bool
    for c in range(C):                                # static channel slices in the C*H axis
        sl = slice(c * H, (c + 1) * H)
        o_ref[:, sl, :] = jnp.where(drop, x0_ref[:, sl, :], x_ref[:, sl, :])


def _wm_cropout_kernel(box_ref, x_ref, x0_ref, o_ref, *, C, H, W):
    # RandomWatermarkCropout(size=(0.5,1.0)): keep the watermarked image only inside the box.
    # Box mask is built in-kernel from iota + 4 SMEM scalars (no HBM mask operand).
    top, bot, left, right = box_ref[0], box_ref[1], box_ref[2], box_ref[3]
    ri = lax.broadcasted_iota(jnp.int32, (H, W), 0)
    ci = lax.broadcasted_iota(jnp.int32, (H, W), 1)
    inside = ((ri >= top) & (ri < bot) & (ci >= left) & (ci < right))[None, :, :]
    for c in range(C):
        sl = slice(c * H, (c + 1) * H)
        o_ref[:, sl, :] = jnp.where(inside, x_ref[:, sl, :], x0_ref[:, sl, :])


def _make_color_kernel(op, C, H):
    # ColorJiggle variants (brightness / contrast / saturation / hue), RGB only (C==3).
    # The denormalize/renormalize affine (mean=std=0.5) is folded into the constants, so a
    # single FMA + clip in normalized [-1,1] space matches DenormalizedAttackWrapper's
    # [0,1]-space op.  Math stays in x.dtype; only the contrast mean accumulates in f32.
    def kernel(f_ref, x_ref, o_ref):
        x = x_ref[...]
        dt = x.dtype
        f = f_ref[0].astype(dt)
        one = jnp.array(1.0, dt)
        if op == "brightness":
            o_ref[...] = jnp.clip(x * f + (f - one), -1.0, 1.0).astype(o_ref.dtype)
            return
        r = x[:, 0 * H:1 * H, :]
        g = x[:, 1 * H:2 * H, :]
        b = x[:, 2 * H:3 * H, :]
        gray = (0.299 * r + 0.587 * g + 0.114 * b).astype(dt)          # (bt, H, W)
        if op == "contrast":
            m = jnp.mean(gray.astype(jnp.float32), axis=(1, 2), keepdims=True).astype(dt)
            o_ref[...] = jnp.clip(x * f + (one - f) * m, -1.0, 1.0).astype(o_ref.dtype)
        elif op == "saturation":
            for c in range(C):
                sl = slice(c * H, (c + 1) * H)
                o_ref[:, sl, :] = jnp.clip(
                    x[:, sl, :] * f + (one - f) * gray, -1.0, 1.0).astype(o_ref.dtype)
        else:  # hue
            # TODO(synk): kornia shifts hue in HSV space; YIQ chroma rotation is an approximation
            # (also verify the 2*pi*factor convention against kornia's hue parameterization).
            cos_h = f_ref[1].astype(dt)
            sin_h = f_ref[2].astype(dt)
            yi = 0.596 * r - 0.274 * g - 0.322 * b
            yq = 0.211 * r - 0.523 * g + 0.312 * b
            i2 = cos_h * yi - sin_h * yq
            q2 = sin_h * yi + cos_h * yq
            o_ref[:, 0 * H:1 * H, :] = jnp.clip(gray + 0.956 * i2 + 0.621 * q2,
                                                -1.0, 1.0).astype(o_ref.dtype)
            o_ref[:, 1 * H:2 * H, :] = jnp.clip(gray - 0.272 * i2 - 0.647 * q2,
                                                -1.0, 1.0).astype(o_ref.dtype)
            o_ref[:, 2 * H:3 * H, :] = jnp.clip(gray - 1.106 * i2 + 1.703 * q2,
                                                -1.0, 1.0).astype(o_ref.dtype)
    return kernel


def _blur_kernel(mw_ref, mh_ref, x_ref, o_ref):
    # Separable reflect-padded gaussian blur, one image-channel at a time on the MXU:
    # width pass (H,W)@(W,W) then height pass (H,H)@(H,W); f32 accumulation, intermediate
    # cast back to x.dtype.  (Blur taps sum to 1, so blurring in normalized [-1,1] space
    # equals the [0,1]-space blur of the DenormalizedAttackWrapper.)
    mw = mw_ref[...]
    mh = mh_ref[...]

    def body(i, carry):
        img = x_ref[i]                                                  # (H, W)
        y1 = jnp.dot(img, mw, preferred_element_type=jnp.float32).astype(img.dtype)
        o_ref[i] = jnp.dot(mh, y1, preferred_element_type=jnp.float32).astype(o_ref.dtype)
        return carry

    lax.fori_loop(0, x_ref.shape[0], body, 0)


# ----------------------------- pallas_call wrappers -----------------------------

def _hflip(x):
    B, C, H, W = x.shape
    N = B * C
    x3 = x.reshape(N, H, W)
    J = jnp.flip(jnp.eye(W, dtype=x.dtype), axis=0)      # x @ J reverses W (exact)
    it = x.dtype.itemsize
    img = _padded_bytes(H, W, it)
    nt = _pick_tile(N, 6 * img, reserve=_padded_bytes(W, W, it))
    spec = pl.BlockSpec((nt, H, W), lambda i: (i, 0, 0))
    out = pl.pallas_call(
        _hflip_kernel,
        out_shape=jax.ShapeDtypeStruct(x3.shape, x.dtype),
        grid=(pl.cdiv(N, nt),),
        in_specs=[spec, pl.BlockSpec((W, W), lambda i: (0, 0))],
        out_specs=spec,
        input_output_aliases={0: 0},
        compiler_params=_PARAMS,
    )(x3, J)
    return out.reshape(B, C, H, W)


def _wm_dropout(x, x0, p, seed):
    B, C, H, W = x.shape
    CH = C * H
    xf, x0f = x.reshape(B, CH, W), x0.reshape(B, CH, W)
    u = jax.random.uniform(jax.random.PRNGKey(seed), (B, H, W), jnp.float32)
    it = x.dtype.itemsize
    img = _padded_bytes(CH, W, it)
    msk = _padded_bytes(H, W, 4)
    bt = _pick_tile(B, 6 * img + 2 * msk)
    spec = pl.BlockSpec((bt, CH, W), lambda i: (i, 0, 0))
    mspec = pl.BlockSpec((bt, H, W), lambda i: (i, 0, 0))
    out = pl.pallas_call(
        partial(_wm_dropout_kernel, C=C, H=H),
        out_shape=jax.ShapeDtypeStruct(xf.shape, x.dtype),
        grid=(pl.cdiv(B, bt),),
        in_specs=[_smem_spec(), spec, spec, mspec],
        out_specs=spec,
        input_output_aliases={1: 0},
        compiler_params=_PARAMS,
    )(jnp.array([p], jnp.float32), xf, x0f, u)
    return out.reshape(B, C, H, W)


def _wm_cropout(x, x0, box):
    B, C, H, W = x.shape
    CH = C * H
    xf, x0f = x.reshape(B, CH, W), x0.reshape(B, CH, W)
    box_arr = jnp.asarray(list(box), jnp.int32)           # (top, bot, left, right) in SMEM
    it = x.dtype.itemsize
    img = _padded_bytes(CH, W, it)
    bt = _pick_tile(B, 6 * img)
    spec = pl.BlockSpec((bt, CH, W), lambda i: (i, 0, 0))
    out = pl.pallas_call(
        partial(_wm_cropout_kernel, C=C, H=H, W=W),
        out_shape=jax.ShapeDtypeStruct(xf.shape, x.dtype),
        grid=(pl.cdiv(B, bt),),
        in_specs=[_smem_spec(), spec, spec],
        out_specs=spec,
        input_output_aliases={1: 0},
        compiler_params=_PARAMS,
    )(box_arr, xf, x0f)
    return out.reshape(B, C, H, W)


def _color(x, op, factor):
    B, C, H, W = x.shape
    assert C == 3, "color attacks require RGB input"
    CH = C * H
    xf = x.reshape(B, CH, W)
    theta = 2.0 * math.pi * factor if op == "hue" else 0.0
    f = jnp.array([factor, math.cos(theta), math.sin(theta)], jnp.float32)
    it = x.dtype.itemsize
    img = _padded_bytes(CH, W, it)
    bt = _pick_tile(B, 8 * img)                            # headroom for hue temporaries
    spec = pl.BlockSpec((bt, CH, W), lambda i: (i, 0, 0))
    out = pl.pallas_call(
        _make_color_kernel(op, C, H),
        out_shape=jax.ShapeDtypeStruct(xf.shape, x.dtype),
        grid=(pl.cdiv(B, bt),),
        in_specs=[_smem_spec(), spec],
        out_specs=spec,
        input_output_aliases={1: 0},
        compiler_params=_PARAMS,
    )(f, xf)
    return out.reshape(B, C, H, W)


def _reflect_blur_matrix(n, K, sigma):
    """1-D gaussian blur operator with reflect padding folded in (rows sum to 1)."""
    pad = K // 2
    r = np.arange(K, dtype=np.float64) - (K - 1) / 2.0
    taps = np.exp(-0.5 * (r / float(sigma)) ** 2)
    taps = taps / taps.sum()
    A = np.zeros((n, n), dtype=np.float32)
    for i in range(n):
        for t in range(K):
            j = i + t - pad
            if j < 0:
                j = -j
            elif j >= n:
                j = 2 * (n - 1) - j
            A[i, j] += taps[t]
    return A


def _gaussian_blur(x, K, sigma):
    B, C, H, W = x.shape
    N = B * C
    x3 = x.reshape(N, H, W)
    Mw = jnp.asarray(_reflect_blur_matrix(W, K, sigma).T, dtype=x.dtype)  # right-mult (width)
    Mh = jnp.asarray(_reflect_blur_matrix(H, K, sigma), dtype=x.dtype)    # left-mult (height)
    it = x.dtype.itemsize
    img = _padded_bytes(H, W, it)
    # Per-step constants: two f32-accum (H,W) temps live inside the loop + the blur matrices.
    reserve = 2 * _padded_bytes(H, W, 4) + _padded_bytes(W, W, it) + _padded_bytes(H, H, it)
    nt = _pick_tile(N, 4 * img, reserve=reserve)           # in 2x + out 2x (double-buffered)
    spec = pl.BlockSpec((nt, H, W), lambda i: (i, 0, 0))
    out = pl.pallas_call(
        _blur_kernel,
        out_shape=jax.ShapeDtypeStruct(x3.shape, x.dtype),
        grid=(pl.cdiv(N, nt),),
        in_specs=[pl.BlockSpec((W, W), lambda i: (0, 0)),
                  pl.BlockSpec((H, H), lambda i: (0, 0)),
                  spec],
        out_specs=spec,
        input_output_aliases={2: 0},
        compiler_params=_PARAMS,
    )(Mw, Mh, x3)
    return out.reshape(B, C, H, W)


# ----------------------------- HiddenAttackLayer.forward -----------------------------

_ATTACKS = ("identity", "hflip", "wm_dropout", "wm_cropout",
            "brightness", "contrast", "saturation", "hue",
            "blur3", "blur5")
# TODO(synk): RandomSizedCrop / RandomResizedCrop, RandomAffine(+/-45deg, +/-90deg) and the
# differentiable JPEG / JPEG2000 / WEBP codecs from the original augmentation list have no
# clean Pallas equivalent and are omitted from the dispatch table.


def hidden_attack_forward(x, x0, seed=0, apply_id=None):
    """Mirror of HiddenAttackLayer.forward: a host-side randint selects ONE attack.

    All attack hyper-parameters are drawn with numpy on the host (like torch.randint),
    so no device->host sync happens before the kernel launch.  `x` is treated as donated
    (kernel outputs alias it); if the caller still needs `x` afterwards, XLA inserts a copy.
    """
    rng = np.random.default_rng(seed)
    if apply_id is None:
        apply_id = int(rng.integers(0, len(_ATTACKS)))
    name = _ATTACKS[apply_id]
    B, C, H, W = x.shape

    if name == "identity":
        return x                                          # Identity(): skip the copy kernel
    if name == "hflip":
        return _hflip(x)
    if name == "wm_dropout":
        p = float(rng.uniform(0.05, 0.2))
        kernel_seed = int(rng.integers(0, 2**31 - 1))
        return _wm_dropout(x, x0, p, kernel_seed)
    if name == "wm_cropout":
        area = float(rng.uniform(0.5, 1.0))               # kept-area fraction
        side = math.sqrt(area)
        ch = max(1, min(H, int(round(H * side))))
        cw = max(1, min(W, int(round(W * side))))
        top = int(rng.integers(0, H - ch + 1))
        left = int(rng.integers(0, W - cw + 1))
        return _wm_cropout(x, x0, (top, top + ch, left, left + cw))
    if name == "brightness":
        return _color(x, "brightness", float(rng.uniform(0.75, 1.25)))
    if name == "contrast":
        return _color(x, "contrast", float(rng.uniform(0.5, 1.5)))
    if name == "saturation":
        return _color(x, "saturation", float(rng.uniform(0.5, 1.5)))
    if name == "hue":
        return _color(x, "hue", float(rng.uniform(-0.1, 0.1)))
    if name == "blur3":
        return _gaussian_blur(x, 3, float(rng.uniform(0.1, 0.9)))
    if name == "blur5":
        return _gaussian_blur(x, 5, float(rng.uniform(0.1, 0.9)))
    raise ValueError(name)


if __name__ == "__main__":
    key = jax.random.PRNGKey(0)
    kx, kx0 = jax.random.split(key)
    B, C, H, W = 2, 3, 16, 16
    # x0 = original (template) image, x = watermarked image; both in [-1, 1], NCHW.
    x0 = jax.random.uniform(kx0, (B, C, H, W), jnp.float32, minval=-1.0, maxval=1.0)
    x = jnp.clip(x0 + 0.05 * jax.random.normal(kx, (B, C, H, W), jnp.float32), -1.0, 1.0)

    # One randomly-selected attack per forward (mirrors HiddenAttackLayer.forward).
    y = jax.block_until_ready(hidden_attack_forward(x, x0, seed=0))
    assert y.shape == x.shape and y.dtype == x.dtype

    # Exercise every implemented branch once (forward_debug-style) to validate all kernels.
    for aid in range(len(_ATTACKS)):
        yi = jax.block_until_ready(hidden_attack_forward(x, x0, seed=aid + 1, apply_id=aid))
        assert yi.shape == x.shape and yi.dtype == x.dtype
        assert bool(jnp.all(jnp.isfinite(yi)))

    print("KERNEL_OK")
</pallas_src>

<mosaic_0001>
module attributes {stable_mosaic.version = 11 : i64} {
  func.func @_blur_kernel(%arg0: i32, %arg1: memref<16x16xf32, #tpu.memory_space<vmem>>, %arg2: memref<16x16xf32, #tpu.memory_space<vmem>>, %arg3: memref<3x16x16xf32, #tpu.memory_space<vmem>>, %arg4: memref<3x16x16xf32, #tpu.memory_space<vmem>>) attributes {dimension_semantics = [#tpu.dimension_semantics<parallel>], iteration_bounds = array<i64: 2>, scalar_prefetch = 0 : i64, scratch_operands = 0 : i64, tpu.core_type = #tpu.core_type<tc>, window_params = [{pipeline_mode = #tpu.pipeline_mode<synchronous>, transform_indices = @transform_0, window_bounds = array<i64: 16, 16>}, {pipeline_mode = #tpu.pipeline_mode<synchronous>, transform_indices = @transform_1, window_bounds = array<i64: 16, 16>}, {transform_indices = @transform_2, window_bounds = array<i64: 3, 16, 16>}, {transform_indices = @transform_3, window_bounds = array<i64: 3, 16, 16>}]} {
    %c0 = arith.constant 0 : index
    %c0_0 = arith.constant 0 : index
    %0 = vector.load %arg1[%c0, %c0_0] : memref<16x16xf32, #tpu.memory_space<vmem>>, vector<16x16xf32>
    %c0_1 = arith.constant 0 : index
    %c0_2 = arith.constant 0 : index
    %1 = vector.load %arg2[%c0_1, %c0_2] : memref<16x16xf32, #tpu.memory_space<vmem>>, vector<16x16xf32>
    %c0_i32 = arith.constant 0 : i32
    %c3_i32 = arith.constant 3 : i32
    %2 = arith.addi %c0_i32, %c3_i32 : i32
    %c1_i32 = arith.constant 1 : i32
    scf.for %arg5 = %c0_i32 to %2 step %c1_i32  : i32 {
      %3 = arith.index_cast %arg5 : i32 to index
      %c0_4 = arith.constant 0 : index
      %c0_5 = arith.constant 0 : index
      %4 = vector.load %arg3[%3, %c0_4, %c0_5] : memref<3x16x16xf32, #tpu.memory_space<vmem>>, vector<1x16x16xf32>
      %5 = vector.shape_cast %4 : vector<1x16x16xf32> to vector<16x16xf32>
      %cst = arith.constant dense<0.000000e+00> : vector<16x16xf32>
      %6 = tpu.matmul %5, %0, %cst {dimension_numbers = #tpu.dot_dimension_numbers<[1], [0], [0], [1], [0, 0, 1, 1], [], []>} : vector<16x16xf32>, vector<16x16xf32>, vector<16x16xf32> -> vector<16x16xf32>
      %cst_6 = arith.constant dense<0.000000e+00> : vector<16x16xf32>
      %7 = tpu.matmul %1, %6, %cst_6 {dimension_numbers = #tpu.dot_dimension_numbers<[1], [0], [0], [1], [0, 0, 1, 1], [], []>} : vector<16x16xf32>, vector<16x16xf32>, vector<16x16xf32> -> vector<16x16xf32>
      %8 = arith.index_cast %arg5 : i32 to index
      %c0_7 = arith.constant 0 : index
      %c0_8 = arith.constant 0 : index
      %9 = vector.load %arg4[%8, %c0_7, %c0_8] : memref<3x16x16xf32, #tpu.memory_space<vmem>>, vector<1x16x16xf32>
      %10 = vector.shape_cast %9 : vector<1x16x16xf32> to vector<16x16xf32>
      %11 = vector.shape_cast %7 : vector<16x16xf32> to vector<1x16x16xf32>
      tpu.vector_store %arg4[%8, %c0_7, %c0_8], %11 {strides = array<i32>} : memref<3x16x16xf32, #tpu.memory_space<vmem>>, vector<1x16x16xf32>,
    }
    %c3_i32_3 = arith.constant 3 : i32
    return
  }
  func.func @transform_0(%arg0: i32) -> (i32, i32) {
    %c0_i32 = arith.constant 0 : i32
    %c0_i32_0 = arith.constant 0 : i32
    %c0_i32_1 = arith.constant 0 : i32
    return %c0_i32, %c0_i32_0 : i32, i32
  }
  func.func @transform_1(%arg0: i32) -> (i32, i32) {
    %c0_i32 = arith.constant 0 : i32
    %c0_i32_0 = arith.constant 0 : i32
    %c0_i32_1 = arith.constant 0 : i32
    return %c0_i32, %c0_i32_0 : i32, i32
  }
  func.func @transform_2(%arg0: i32) -> (i32, i32, i32) {
    %c0_i32 = arith.constant 0 : i32
    %c0_i32_0 = arith.constant 0 : i32
    %c0_i32_1 = arith.constant 0 : i32
    return %arg0, %c0_i32, %c0_i32_0 : i32, i32, i32
  }
  func.func @transform_3(%arg0: i32) -> (i32, i32, i32) {
    %c0_i32 = arith.constant 0 : i32
    %c0_i32_0 = arith.constant 0 : i32
    %c0_i32_1 = arith.constant 0 : i32
    return %arg0, %c0_i32, %c0_i32_0 : i32, i32, i32
  }
}

</mosaic_0001>

<bundles_post_ra>
// kernel: tpu_custom_call.1
= control target key start
LH: loop header
LB: loop body
LE: loop exit
PB: predicated region body
PF: predicated region fallthrough
CT: control target
= control target key end

     0   :  { %8 = vsyncpa [#allocation3], 0  ;;  %s731_s0 = inlined_call_operand.vmem [shape: f32[16,16], index: 0, kind: input, shape index: {}]   ;;  %s732_s1 = inlined_call_operand.vmem [shape: f32[16,16], index: 1, kind: input, shape index: {}]   ;;  %s733_s2 = inlined_call_operand.hbm [shape: f32[6,16,16], index: 2, kind: input, shape index: {}, may-alias: {2,3}]   ;;  %s734_s3 = inlined_call_operand.hbm [shape: f32[6,16,16], index: 3, kind: output, shape index: {}, may-alias: {2,3}]  }
   0x1   :  { %10 = vsyncpa [#allocation3 + $0x1], 0 }
   0x2   :  { %11 = vsyncpa [#allocation4], 0 }
   0x3   :  { %13 = vsyncpa [#allocation4 + $0x1], 0  ;;  %s584_s12 = smov 0   ;;  %s586_s13 = smov 0  }
   0x4   :  { %s588_s14 = smov 0   ;;  %s590_s15 = smov 0  }
   0x5 LB: > { %s605_s16 = sadd.s32 4294967295, %s554_s15   ;;  %s369_s17 = sadd.s32 4294967294, %s554_s15   ;;  %s554_s15 = sphi %s590_s15, %s742_s15   ;;  %s550_s14 = sphi %s588_s14, %s741_s14   ;;  %s546_s13 = sphi %s586_s13, %s740_s13   ;;  %s542_s12 = sphi %s584_s12, %s739_s12  }
   0x6   : > { %s609_s18 = sadd.s32 1, %s554_s15   ;;  %s68_s19 = sadd.s32 1, %s550_s14 }
   0x7   : > { %s65_s20 = ssub.s32 %s554_s15, %s609_s18  ;;  %p75_p0 = scmp.ne.s32.totalorder %s550_s14, %s546_s13 }
   0x8   : > { %p66_p1 = scmp.eq.s32.totalorder %s65_s20, 0  ;;  %p76_p2 = scmp.eq.s32.totalorder %s554_s15, 0 }
   0x9   : > { %p81_p3 = scmp.ne.s32.totalorder %s546_s13, %s542_s12  ;;  %p82_p4 = scmp.eq.s32.totalorder %s605_s16, 0 }
   0xa   : > { %s621_s21 = scalar_select %p66_p1, %s550_s14, %s68_s19  }
   0xb   : > { %p77_p5 = por %p76_p2, %p75_p0  ;;  %p623_p6 = por %p82_p4, %p81_p3 }
   0xc   : > { %p105_p7 = scmp.eq.s32.totalorder %s605_s16, 1  ;;  %p111_p8 = scmp.eq.s32.totalorder %s369_s17, 1 }
   0xd   : > { %p371_p9 = scmp.ge.s32.totalorder %s554_s15, 2  ;;  %p408_p10 = scmp.lt.s32.totalorder %s554_s15, 2 }
   0xe   : > { %p630_p11 = por %p105_p7, %p75_p0  ;;  %p634_p12 = por %p111_p8, %p81_p3 }
   0xf   : > { %s137_s25 = sand.u32 1, %s550_s14   ;;  %s388_s26 = smul.u32 48, %s554_s15 }
  0x10   : > { %s394_s27 = smul.u32 48, %s137_s25  ;;  %p643_p13 = pnand %p408_p10, %p77_p5 }
  0x11   : > { %s147_s30 = scalar_lea.hbm %s733_s2, %s388_s26  ;;  %s138_s8 = scalar_lea.sflag [#allocation3], %s137_s25 }
  0x12   : > { %s148_s5 = sshll.u32 %s147_s30, 4  ;;  %s141_s6 = scalar_lea.vmem [#allocation2], %s394_s27  ;;  %s149_s5 = int_to_ptr.hbm [resolvable:$true] %s148_s5 }
  0x13   : > { %s150_s7 = sshll.u32 %s141_s6, 4  ;;  %s454_s9 = sshra.s32 %s149_s5, 4  ;;  %s151_s7 = int_to_ptr.vmem [resolvable:$true] %s150_s7  ;;  %s455_s9 = int_to_ptr.hbm [resolvable:$true] %s454_s9 }
  0x14   : > { %s456_s10 = scalar_lea.hbm %s455_s9, 48  ;;  %p458_p1 = pneg %p643_p13 }
  0x15   : > { %p457_p0 = scmp.ne.s32.totalorder %s455_s9, %s456_s10  ;;  %s461_s19 = scalar_lea.hbm %s733_s2, 96 }
  0x16   : > { %p462_p4 = scmp.lt.s32.totalorder %s455_s9, %s733_s2  ;;  %p463_p5 = scmp.lt.s32.totalorder %s461_s19, %s456_s10 }
  0x17   : > { %p459_p2 = pnand %p458_p1, %p457_p0 }
  0x18   : > { %p464_p7 = por %p463_p5, %p462_p4 }
  0x19   : > { %p460_p3 = pneg %p459_p2 }
  0x1b   : > { %p465_p8 = pnand %p464_p7, %p460_p3 }
  0x1d   : > { %468 = shalt.err (!%p465_p8)
}
  0x1e   : > { %s560_s25 = smov 128   ;;  %s561_s27 = smov 8  }
  0x1f   : > { %403 = dma.hbm_to_vmem [thread:$0]  (!%p643_p13), %s149_s5, 768, %s151_s7, %s138_s8, %s560_s25, %s560_s25, %s561_s27  }
  0x20   : > { %p374_p10 = scmp.ge.s32.totalorder %s554_s15, 1  ;;  %p158_p0 = scmp.lt.s32.totalorder %s554_s15, 3 }
  0x22   : > { %p159_p1 = pnand %p374_p10, %p158_p0 }
  0x23   : > { %s660_s28 = sand.u32 (!%p159_p1), 1, %s546_s13  }
  0x24   : > { %162 = sbr.rel (%p159_p1) target bundleno = 318 (0x13e), region = 32  ;;  %s165_s30 = scalar_lea.sflag (!%p159_p1), [#allocation3], %s660_s28 }
  0x25   : > { %s395_s29 = smul.u32 (!%p159_p1), 48, %s660_s28 }
  0x27   : > { %s664_s6 = scalar_lea.vmem (!%p159_p1), [#allocation2], %s395_s29 }
  0x29   : > { %533 = dma.done.wait (%p623_p6), %s165_s30, 768  }
  0x2a   : > { %535 = vsyncadd (%p623_p6), %s165_s30, 4294966528  ;;  %v194_v0 = vld [vmem:[%s731_s0] sm:$0xff]  ;;  %v195_v1 = vld [vmem:[%s731_s0 + $0x8] sm:$0xff]  ;;  %s682_s19 = scalar_lea.vmem [#allocation5], %s395_s29  ;;  %s684_s22 = smov 0  }
  0x2b   : > { %v196_v2 = vld [vmem:[%s732_s1] sm:$0xff]  ;;  %v197_v3 = vld [vmem:[%s732_s1 + $0x8] sm:$0xff] }
  0x2c LB: >> { %390 = vmatpush.msra.mxu2 %v195_v1  ;;  %229 = vmatpush.msra.mxu0 %v195_v1  ;;  %s375_s20 = sshll.u32 %s558_s22, 4  ;;  %vm208_vm0 = vcmask 130048   ;;  %s203_s22 = sadd.s32 1, %s558_s22   ;;  %s558_s22 = sphi %s684_s22, %s203_s22  }
  0x2d   : >> { %s205_s26 = scalar_lea.vmem %s664_s6, %s375_s20 [#allocation2]  ;;  %s267_s25 = scalar_lea.vmem %s682_s19, %s375_s20 [#allocation5] }
  0x2e   : >> { %391 = vmatpush.msra.mxu2 %v194_v0  ;;  %230 = vmatpush.msra.mxu0 %v194_v0  ;;  %v207_v4 = vld [vmem:[%s205_s26 + $0x8] sm:$0xff]  ;;  %v206_v5 = vld [vmem:[%s205_s26] sm:$0xff]  ;;  %p200_p6 = scmp.ge.s32.totalorder %s203_s22, 3  }
  0x2f   : >> { %377 = vmatmul.msk.f32.vlgmr.msra.gmra.mxu2 %vm208_vm0, %v207_v4  ;;  %376 = vmatmul.msk.f32.vlgmr.msra.gmra.mxu0 %vm208_vm0, %v206_v5  ;;  %s389_s27 = smul.u32 (%p200_p6), 48, %s605_s16  ;;  %s284_s29 = sshll.u32 (%p200_p6), %s682_s19, 4  ;;  %s285_s29 = int_to_ptr.vmem [resolvable:$true] %s284_s29 }
  0x30   : > { %s271_s8 = scalar_lea.sflag (%p200_p6), [#allocation4], %s660_s28  ;;  %s504_s16 = scalar_lea.hbm (%p200_p6), %s734_s3, 96 }
  0x31   : > { %s283_s5 = scalar_lea.hbm (%p200_p6), %s734_s3, %s389_s27 }
  0x32   : > { %s286_s7 = sshll.u32 (%p200_p6), %s283_s5, 4  ;;  %s287_s7 = int_to_ptr.hbm [resolvable:$true] %s286_s7 }
  0x33   : > { %s498_s9 = sshra.s32 (%p200_p6), %s287_s7, 4  ;;  %s499_s9 = int_to_ptr.hbm [resolvable:$true] %s498_s9 }
  0x34   : > { %s500_s10 = scalar_lea.hbm (%p200_p6), %s499_s9, 48  ;;  %p505_p4 = scmp.lt.s32.totalorder (%p200_p6), %s499_s9, %s734_s3 }
  0x35   : > { %p501_p13 = scmp.ne.s32.totalorder (%p200_p6), %s499_s9, %s500_s10  ;;  %p506_p5 = scmp.lt.s32.totalorder (%p200_p6), %s504_s16, %s500_s10 }
  0x37   : > { %p502_p2 = pnand (%p200_p6), %p501_p13, %p630_p11  ;;  %p507_p7 = por (%p200_p6), %p506_p5, %p505_p4 }
  0x39   : > { %p503_p3 = pneg (%p200_p6), %p502_p2 }
  0x3b   : > { %p508_p8 = pnand (%p200_p6), %p507_p7, %p503_p3 }
  0xac   : >> { %v232_v7 = vpop.f32.mrf.mxu0 }
  0xb2   : >> { %v235_v6 = vpop.f32.mrf.mxu2 }
  0xb3   : >> { %258 = vmatpush.msra.mxu1 %v235_v6  ;;  %392 = vmatpush.msra.mxu3 %v235_v6 }
  0xb5   : >> { %259 = vmatpush.msra.mxu1 %v232_v7  ;;  %393 = vmatpush.msra.mxu3 %v232_v7 }
  0xb6   : >> { %379 = vmatmul.msk.f32.vlgmr.msra.gmra.mxu3 %vm208_vm0, %v197_v3  ;;  %378 = vmatmul.msk.f32.vlgmr.msra.gmra.mxu1 %vm208_vm0, %v196_v2 }
 0x133   : >> { %v261_v8 = vpop.f32.mrf.mxu1 }
 0x134   : >> { %268 = vst.msk [vmem:[%s267_s25] sm:$0xff] %vm208_vm0, %v261_v8 }
 0x136   : > { %202 = sbr.rel (!%p200_p6) target bundleno = 44 (0x2c), region = 86 }
 0x139   : >> { %v264_v9 = vpop.f32.mrf.mxu3 }
 0x13a   : >> { %269 = vst.msk [vmem:[%s267_s25 + $0x8] sm:$0xff] %vm208_vm0, %v264_v9 }
 0x13b   : > { %511 = shalt.err (!%p508_p8)
}
 0x13c   : > { %s562_s28 = smov 128   ;;  %s563_s22 = smov 8  }
 0x13d   : > { %398 = dma.vmem_to_hbm [thread:$0]  (%p630_p11), %s285_s29, 768, %s287_s7, %s271_s8, %s562_s28, %s562_s28, %s563_s22  }
 0x13e PF: > { %s301_s20 = sand.u32 1, %s542_s12   ;;  %p405_p10 = pnand %p371_p9, %p634_p12 }
 0x13f   : > { %s302_s26 = scalar_lea.sflag [#allocation4], %s301_s20 }
 0x140   : > { %p406_p0 = pneg %p405_p10 }
 0x142   : > { %537 = dma.done.wait (%p406_p0), %s302_s26, 768  }
 0x143   : > { %539 = vsyncadd (%p406_p0), %s302_s26, 4294966528  ;;  %p16_p1 = scmp.ge.s32.totalorder %s609_s18, 4   ;;  %s739_s12 = smov %s546_s13 }
 0x144   : > { %s740_s13 = smov %s550_s14  ;;  %s741_s14 = smov %s621_s21 }
 0x145   : > { %s742_s15 = smov %s609_s18  ;;  %18 = sbr.rel (!%p16_p1) target bundleno = 5 (0x5), region = 97 }
 0x14a   :  { %308 = vsyncpa [#allocation3], 1 }
 0x14b   :  { %310 = vsyncpa [#allocation3 + $0x1], 1 }
 0x14c   :  { %311 = vsyncpa [#allocation4], 1 }
 0x14d   :  { %313 = vsyncpa [#allocation4 + $0x1], 1 }

</bundles_post_ra>
